<compile_context>
chip_gen: v7x
topology: tpu7x:2x2x1
jax: 0.10.0
libtpu: 0.0.40
codegen_flags: <defaults>
</compile_context>

<pallas_src>
import numpy as np
import jax
import jax.numpy as jnp
from jax.experimental import pallas as pl
from jax.experimental.pallas import tpu as pltpu


# ----- synthetic module-level globals (small, deterministic) -----------------
IDX_MAP = {
    "lips":       list(range(0, 10)),
    "left_hand":  list(range(10, 18)),
    "upper_body": list(range(18, 24)),
    "right_hand": list(range(24, 32)),
}

_GROUP_ORDER = ("lips", "left_hand", "upper_body", "right_hand")


class PreprocessingConfig:
    params_FIXED_FRAMES = 16


# ----- Pallas kernel ----------------------------------------------------------
def _preprocess_kernel(x_ref, w_ref, o_ref):
    # x_ref: (F, FEAT_PAD)   -- lane padding is NaN, so it drops out of the stats
    # w_ref: (FIXED, F)      -- static frame-interpolation matrix
    # o_ref: (FIXED, FEAT_PAD)
    x = x_ref[...]                                          # (F, FEAT_PAD)
    mask = jnp.logical_not(jnp.isnan(x))                    # reused twice
    xz = jnp.where(mask, x, 0.0)

    # Single-pass global non-NaN statistics (three independent reductions).
    cnt = jnp.sum(mask.astype(jnp.float32))
    s = jnp.sum(xz)
    sq = jnp.sum(xz * xz)

    cnt_safe = jnp.maximum(cnt, 1.0)
    mean = s / cnt_safe
    denom = jnp.maximum(cnt - 1.0, 1.0)                     # unbiased (N-1), guarded
    var = jnp.maximum((sq - s * mean) / denom, 0.0)         # guard tiny negatives
    inv_std = jax.lax.rsqrt(var)                            # EUP

    # Normalize + NaN->0 in a single select (mask independent of mean/inv_std).
    x_n = jnp.where(mask, (x - mean) * inv_std, 0.0)

    # Frame interpolation as a matmul: out[t, lc] = sum_f W[t, f] * x_n[f, lc].
    o_ref[...] = jnp.dot(w_ref[...], x_n, preferred_element_type=jnp.float32)


# ----- host-side glue ---------------------------------------------------------
def _interp_matrix(n_in: int, n_out: int) -> np.ndarray:
    """Frame-axis interpolation matrix matching torch.nn.functional.interpolate."""
    W = np.zeros((n_out, n_in), dtype=np.float32)
    scale = n_in / n_out
    if n_in < n_out:
        # mode='linear', align_corners=False
        for i in range(n_out):
            src = max(0.0, (i + 0.5) * scale - 0.5)
            i0 = min(int(np.floor(src)), n_in - 1)
            i1 = min(i0 + 1, n_in - 1)
            lam = src - i0
            W[i, i0] += 1.0 - lam
            W[i, i1] += lam
    else:
        # mode='nearest-exact'
        for i in range(n_out):
            idx = min(int(np.floor((i + 0.5) * scale)), n_in - 1)
            W[i, idx] = 1.0
    return W


def _selected_flat_cols(n_coords: int):
    sel_idx = np.concatenate(
        [np.asarray(IDX_MAP[k], dtype=np.int32) for k in _GROUP_ORDER]
    )
    cols = (sel_idx[:, None] * n_coords + np.arange(n_coords)[None, :]).reshape(-1)
    return cols.astype(np.int32), sel_idx


def feature_preprocess_batched(xb: jax.Array) -> jax.Array:
    """xb: (B, n_frames, n_landmarks, n_coords) float32, may contain NaNs."""
    B, n_frames, n_landmarks, n_coords = xb.shape
    fixed = PreprocessingConfig.params_FIXED_FRAMES

    feat = n_landmarks * n_coords
    feat_pad = int(pl.cdiv(feat, 128)) * 128                # lane-dense feature axis

    x2 = xb.reshape(B, n_frames, feat).astype(jnp.float32)
    if feat_pad > feat:
        # Pad with NaN: excluded from stats, zeroed by NaN->0, zero after the matmul.
        x2 = jnp.pad(x2, ((0, 0), (0, 0), (0, feat_pad - feat)),
                     constant_values=np.float32(np.nan))

    w = jnp.asarray(_interp_matrix(n_frames, fixed))        # (fixed, n_frames)

    out_pad = pl.pallas_call(
        _preprocess_kernel,
        out_shape=jax.ShapeDtypeStruct((B, fixed, feat_pad), jnp.float32),
        grid=(B,),
        in_specs=[
            pl.BlockSpec((None, n_frames, feat_pad), lambda b: (b, 0, 0)),
            pl.BlockSpec((fixed, n_frames), lambda b: (0, 0)),
        ],
        out_specs=pl.BlockSpec((None, fixed, feat_pad), lambda b: (b, 0, 0)),
        compiler_params=pltpu.CompilerParams(dimension_semantics=("parallel",)),
    )(x2, w)

    # Landmark-group gather commutes with the frame matmul -> apply it on the tiny
    # (B, fixed, feat_pad) output instead of the big input.
    sel_cols, sel_idx = _selected_flat_cols(n_coords)
    out_sel = jnp.take(out_pad, jnp.asarray(sel_cols), axis=-1)
    return out_sel.reshape(B, fixed, sel_idx.shape[0], n_coords)


def feature_preprocess(x: jax.Array) -> jax.Array:
    """x: (n_frames, n_landmarks, n_coords) — matches the PyTorch module's forward."""
    return feature_preprocess_batched(x[None])[0]


# ----- pure-numpy reference (torch semantics) ---------------------------------
def _reference_np(x: np.ndarray, fixed: int) -> np.ndarray:
    x = np.array(x, dtype=np.float64)
    x = x - x[~np.isnan(x)].mean()
    x = x / x[~np.isnan(x)].std(ddof=1)                     # unbiased, like torch
    sel = np.concatenate([x[:, IDX_MAP[k]] for k in _GROUP_ORDER], axis=1)
    sel = np.nan_to_num(sel, nan=0.0)
    W = _interp_matrix(x.shape[0], fixed).astype(np.float64)
    return np.einsum("tf,flc->tlc", W, sel)                 # == permute/interp/permute


# ----- demo -------------------------------------------------------------------
if __name__ == "__main__":
    key = jax.random.PRNGKey(0)
    fixed = PreprocessingConfig.params_FIXED_FRAMES
    n_landmarks, n_coords = 40, 3
    n_sel = sum(len(v) for v in IDX_MAP.values())

    k1, k2 = jax.random.split(key)

    # Case 1: batched, upsampling path (n_frames < FIXED -> 'linear').
    B, F1 = 2, 8
    x1 = jax.random.normal(k1, (B, F1, n_landmarks, n_coords), jnp.float32) * 2.0 + 0.5
    x1 = x1.at[:, 1, 3, :].set(jnp.nan)
    x1 = x1.at[0, 5, 20, 1].set(jnp.nan)
    out1 = jax.block_until_ready(feature_preprocess_batched(x1))
    assert out1.shape == (B, fixed, n_sel, n_coords), out1.shape
    assert bool(jnp.all(jnp.isfinite(out1))), "batched output contains non-finite values"
    for b in range(B):
        ref = _reference_np(np.asarray(x1[b]), fixed)
        np.testing.assert_allclose(np.asarray(out1[b]), ref, rtol=2e-3, atol=1e-3)

    # Case 2: single sample, downsampling path (n_frames >= FIXED -> 'nearest-exact').
    F2 = 24
    x2 = jax.random.normal(k2, (F2, n_landmarks, n_coords), jnp.float32) - 1.0
    x2 = x2.at[3, 7, :].set(jnp.nan)
    out2 = jax.block_until_ready(feature_preprocess(x2))
    assert out2.shape == (fixed, n_sel, n_coords), out2.shape
    assert bool(jnp.all(jnp.isfinite(out2))), "single-sample output contains non-finite values"
    ref2 = _reference_np(np.asarray(x2), fixed)
    np.testing.assert_allclose(np.asarray(out2), ref2, rtol=2e-3, atol=1e-3)

    print("KERNEL_OK")
</pallas_src>

<mosaic_0001>
module attributes {stable_mosaic.version = 11 : i64} {
  func.func @_preprocess_kernel(%arg0: i32, %arg1: memref<1x8x128xf32, #tpu.memory_space<vmem>>, %arg2: memref<16x8xf32, #tpu.memory_space<vmem>>, %arg3: memref<1x16x128xf32, #tpu.memory_space<vmem>>) attributes {dimension_semantics = [#tpu.dimension_semantics<parallel>], iteration_bounds = array<i64: 2>, scalar_prefetch = 0 : i64, scratch_operands = 0 : i64, tpu.core_type = #tpu.core_type<tc>, window_params = [{transform_indices = @transform_0, window_bounds = array<i64: 1, 8, 128>}, {pipeline_mode = #tpu.pipeline_mode<synchronous>, transform_indices = @transform_1, window_bounds = array<i64: 16, 8>}, {transform_indices = @transform_2, window_bounds = array<i64: 1, 16, 128>}]} {
    %c0 = arith.constant 0 : index
    %c0_0 = arith.constant 0 : index
    %c0_1 = arith.constant 0 : index
    %0 = vector.load %arg1[%c0, %c0_0, %c0_1] : memref<1x8x128xf32, #tpu.memory_space<vmem>>, vector<1x8x128xf32>
    %1 = vector.shape_cast %0 : vector<1x8x128xf32> to vector<8x128xf32>
    %2 = arith.cmpf one, %1, %1 : vector<8x128xf32>
    %cst = arith.constant dense<true> : vector<8x128xi1>
    %3 = arith.xori %2, %cst : vector<8x128xi1>
    %cst_2 = arith.constant 0.000000e+00 : f32
    %4 = vector.broadcast %cst_2 : f32 to vector<8x128xf32>
    %5 = arith.select %3, %1, %4 : vector<8x128xi1>, vector<8x128xf32>
    %6 = arith.extui %3 : vector<8x128xi1> to vector<8x128xi32>
    %7 = arith.sitofp %6 : vector<8x128xi32> to vector<8x128xf32>
    %8 = vector.shape_cast %7 : vector<8x128xf32> to vector<1x8x128xf32>
    %cst_3 = arith.constant dense<0.000000e+00> : vector<1xf32>
    %9 = vector.multi_reduction <add>, %8, %cst_3 [1, 2] : vector<1x8x128xf32> to vector<1xf32>
    %10 = vector.shape_cast %9 : vector<1xf32> to vector<1x1x1xf32>
    %11 = vector.extract %10[0, 0, 0] : f32 from vector<1x1x1xf32>
    %12 = vector.shape_cast %5 : vector<8x128xf32> to vector<1x8x128xf32>
    %cst_4 = arith.constant dense<0.000000e+00> : vector<1xf32>
    %13 = vector.multi_reduction <add>, %12, %cst_4 [1, 2] : vector<1x8x128xf32> to vector<1xf32>
    %14 = vector.shape_cast %13 : vector<1xf32> to vector<1x1x1xf32>
    %15 = vector.extract %14[0, 0, 0] : f32 from vector<1x1x1xf32>
    %16 = arith.mulf %5, %5 : vector<8x128xf32>
    %17 = vector.shape_cast %16 : vector<8x128xf32> to vector<1x8x128xf32>
    %cst_5 = arith.constant dense<0.000000e+00> : vector<1xf32>
    %18 = vector.multi_reduction <add>, %17, %cst_5 [1, 2] : vector<1x8x128xf32> to vector<1xf32>
    %19 = vector.shape_cast %18 : vector<1xf32> to vector<1x1x1xf32>
    %20 = vector.extract %19[0, 0, 0] : f32 from vector<1x1x1xf32>
    %cst_6 = arith.constant 1.000000e+00 : f32
    %21 = arith.maximumf %11, %cst_6 : f32
    %22 = arith.divf %15, %21 : f32
    %cst_7 = arith.constant 1.000000e+00 : f32
    %23 = arith.subf %11, %cst_7 : f32
    %cst_8 = arith.constant 1.000000e+00 : f32
    %24 = arith.maximumf %23, %cst_8 : f32
    %25 = arith.mulf %15, %22 : f32
    %26 = arith.subf %20, %25 : f32
    %27 = arith.divf %26, %24 : f32
    %cst_9 = arith.constant 0.000000e+00 : f32
    %28 = arith.maximumf %27, %cst_9 : f32
    %29 = math.rsqrt %28 : f32
    %30 = vector.broadcast %22 : f32 to vector<8x128xf32>
    %31 = arith.subf %1, %30 : vector<8x128xf32>
    %32 = vector.broadcast %29 : f32 to vector<8x128xf32>
    %33 = arith.mulf %31, %32 : vector<8x128xf32>
    %cst_10 = arith.constant 0.000000e+00 : f32
    %34 = vector.broadcast %cst_10 : f32 to vector<8x128xf32>
    %35 = arith.select %3, %33, %34 : vector<8x128xi1>, vector<8x128xf32>
    %c0_11 = arith.constant 0 : index
    %c0_12 = arith.constant 0 : index
    %36 = vector.load %arg2[%c0_11, %c0_12] : memref<16x8xf32, #tpu.memory_space<vmem>>, vector<16x8xf32>
    %cst_13 = arith.constant dense<0.000000e+00> : vector<16x128xf32>
    %37 = tpu.matmul %36, %35, %cst_13 {dimension_numbers = #tpu.dot_dimension_numbers<[1], [0], [0], [1], [0, 0, 1, 1], [], []>} : vector<16x8xf32>, vector<8x128xf32>, vector<16x128xf32> -> vector<16x128xf32>
    %c0_14 = arith.constant 0 : index
    %c0_15 = arith.constant 0 : index
    %c0_16 = arith.constant 0 : index
    %38 = vector.load %arg3[%c0_14, %c0_15, %c0_16] : memref<1x16x128xf32, #tpu.memory_space<vmem>>, vector<1x16x128xf32>
    %39 = vector.shape_cast %38 : vector<1x16x128xf32> to vector<16x128xf32>
    %40 = vector.shape_cast %37 : vector<16x128xf32> to vector<1x16x128xf32>
    tpu.vector_store %arg3[%c0_14, %c0_15, %c0_16], %40 {strides = array<i32>} : memref<1x16x128xf32, #tpu.memory_space<vmem>>, vector<1x16x128xf32>,
    return
  }
  func.func @transform_0(%arg0: i32) -> (i32, i32, i32) {
    %c0_i32 = arith.constant 0 : i32
    %c0_i32_0 = arith.constant 0 : i32
    %c0_i32_1 = arith.constant 0 : i32
    return %arg0, %c0_i32, %c0_i32_0 : i32, i32, i32
  }
  func.func @transform_1(%arg0: i32) -> (i32, i32) {
    %c0_i32 = arith.constant 0 : i32
    %c0_i32_0 = arith.constant 0 : i32
    %c0_i32_1 = arith.constant 0 : i32
    return %c0_i32, %c0_i32_0 : i32, i32
  }
  func.func @transform_2(%arg0: i32) -> (i32, i32, i32) {
    %c0_i32 = arith.constant 0 : i32
    %c0_i32_0 = arith.constant 0 : i32
    %c0_i32_1 = arith.constant 0 : i32
    return %arg0, %c0_i32, %c0_i32_0 : i32, i32, i32
  }
}

</mosaic_0001>

<bundles_post_ra>
// kernel: tpu_custom_call.1
= control target key start
LH: loop header
LB: loop body
LE: loop exit
PB: predicated region body
PF: predicated region fallthrough
CT: control target
= control target key end

     0   :  { %7 = vsyncpa [#allocation3], 0  ;;  %s660_s0 = inlined_call_operand.vmem [shape: f32[2,8,128], index: 0, kind: input, shape index: {}]   ;;  %s661_s1 = inlined_call_operand.vmem [shape: f32[16,8], index: 1, kind: input, shape index: {}]   ;;  %s662_s2 = inlined_call_operand.hbm [shape: f32[2,16,128], index: 2, kind: output, shape index: {}]  }
   0x1   :  { %9 = vsyncpa [#allocation3 + $0x1], 0  ;;  %s531_s9 = smov 0   ;;  %s533_s10 = smov 0  }
   0x2   :  { %s535_s11 = smov 0   ;;  %s537_s12 = smov 0  }
   0x3 LB: > { %s552_s13 = sadd.s32 4294967295, %s507_s12   ;;  %s357_s14 = sadd.s32 4294967294, %s507_s12   ;;  %s507_s12 = sphi %s537_s12, %s670_s12   ;;  %s503_s11 = sphi %s535_s11, %s669_s11   ;;  %s499_s10 = sphi %s533_s10, %s668_s10   ;;  %s495_s9 = sphi %s531_s9, %s667_s9  }
   0x4   : > { %s556_s15 = sadd.s32 1, %s507_s12   ;;  %s69_s16 = sadd.s32 1, %s503_s11 }
   0x5   : > { %s66_s17 = ssub.s32 %s507_s12, %s556_s15  ;;  %p79_p0 = scmp.ne.s32.totalorder %s503_s11, %s499_s10 }
   0x6   : > { %p67_p1 = scmp.eq.s32.totalorder %s66_s17, 0  ;;  %p80_p2 = scmp.eq.s32.totalorder %s552_s13, 1 }
   0x7   : > { %p85_p3 = scmp.ne.s32.totalorder %s499_s10, %s495_s9  ;;  %p86_p4 = scmp.eq.s32.totalorder %s357_s14, 1 }
   0x8   : > { %s567_s18 = scalar_select %p67_p1, %s503_s11, %s69_s16  }
   0x9   : > { %p569_p5 = por %p80_p2, %p79_p0  ;;  %p573_p6 = por %p86_p4, %p85_p3 }
   0xa   : > { %p360_p7 = scmp.ge.s32.totalorder %s507_s12, 1  ;;  %p114_p8 = scmp.lt.s32.totalorder %s507_s12, 3 }
   0xc   : > { %p115_p9 = pnand %p360_p7, %p114_p8 }
   0xd   : > { %p135_p10 = scmp.lt.s32.totalorder (!%p115_p9), %s552_s13, 1  ;;  %vm509_vm1 = vmmov (!%p115_p9), 1   ;;  %v510_v2 = vmov (!%p115_p9), 0.0   ;;  %s511_s27 = smov (!%p115_p9), 1.0   ;;  %v195_v29 = vld [vmem:[%s661_s1] sm:$0xff] (!%p115_p9)  ;;  %vm197_vm3 = vcmask (!%p115_p9), 64512  }
   0xe   : > { %118 = sbr.rel (%p115_p9) target bundleno = 600 (0x258), region = 28  ;;  %379 = vmatprep.mubr.msk.f32.mxu0 (!%p115_p9), %vm197_vm3, %v195_v29  ;;  %v196_v38 = vld [vmem:[%s661_s1 + $0x8] sm:$0xff] (!%p115_p9)  ;;  %s373_s3 = sshll.u32 (!%p115_p9), %s552_s13, 8 }
  0x15   : > { %s136_s21 = scalar_select %p135_p10, %s552_s13, 1 }
  0x16   : > { %s513_s13 = smov [#allocation2]  }
  0x17   : > { %s362_s22 = sshll.u32 %s136_s21, 3 }
  0x18   : > { %s138_s25 = scalar_lea.vmem %s660_s0, %s362_s22  ;;  %s512_s22 = smov 0.0  }
  0x19   : > { %v584_v0 = vld [vmem:[%s138_s25] sm:$0xff] }
  0x1a   : > { %vm140_vm0 = vcmp.ne.f32.partialorder %v584_v0, %v584_v0 }
  0x1b   : > { %vm588_vm2 = vmxor %vm140_vm0, %vm509_vm1 }
  0x1c   : > { %v363_v3 = vsel %vm588_vm2, 1.0, %v510_v2  ;;  %v142_v4 = vsel %vm588_vm2, %v584_v0, 0.0 }
  0x1d   : > { %145 = vadd.xlane.f32.xlu0 %v363_v3  ;;  %v163_v5 = vmul.f32 %v142_v4, %v142_v4 }
  0x1f   : > { %164 = vadd.xlane.f32.xlu1 %v163_v5 }
  0x21   : > { %154 = vadd.xlane.f32.xlu0 %v142_v4 }
  0xaa   : > { %v146_v6 = vpop.xlane.xlu0 %145 }
  0xab   : > { %v147_v7 = vrot.slane %v146_v6, 4 }
  0xac   : > { %v165_v8 = vpop.xlane.xlu1 %164 }
  0xad   : > { %v148_v9 = vadd.f32 %v147_v7, %v146_v6  ;;  %v166_v10 = vrot.slane %v165_v8, 4 }
  0xae   : > { %v155_v11 = vpop.xlane.xlu0 %154 }
  0xaf   : > { %v149_v12 = vrot.slane %v148_v9, 2  ;;  %v156_v13 = vrot.slane %v155_v11, 4  ;;  %v167_v14 = vadd.f32 %v166_v10, %v165_v8 }
  0xb1   : > { %v150_v15 = vadd.f32 %v149_v12, %v148_v9  ;;  %v157_v16 = vadd.f32 %v156_v13, %v155_v11  ;;  %v168_v17 = vrot.slane %v167_v14, 2 }
  0xb3   : > { %v151_v18 = vrot.slane %v150_v15, 1  ;;  %v158_v19 = vrot.slane %v157_v16, 2  ;;  %v169_v20 = vadd.f32 %v168_v17, %v167_v14 }
  0xb5   : > { %v152_v21 = vadd.f32 %v151_v18, %v150_v15  ;;  %v159_v22 = vadd.f32 %v158_v19, %v157_v16  ;;  %v170_v23 = vrot.slane %v169_v20, 1 }
  0xb7   : > { %382 = vpush %v152_v21  ;;  %v160_v24 = vrot.slane %v159_v22, 1  ;;  %v171_v25 = vadd.f32 %v170_v23, %v169_v20 }
  0xb9   : > { %v161_v26 = vadd.f32 %v160_v24, %v159_v22 }
  0xbb   : > { %384 = vpush %v161_v26 }
  0xbc   : > { %386 = vpush %v171_v25 }
  0xe8   : > { %s383_s26 = spop %382 }
  0xe9   : > { %s173_s28 = smax.f32 %s511_s27, %s383_s26  ;;  %s364_s29 = sadd.f32 -1.0, %s383_s26 }
  0xea   : > { %v174_v27 = vstv %s173_s28 }
  0xeb   : > { %439 = vrcp.f32 %v174_v27  ;;  %s179_s30 = smax.f32 %s511_s27, %s364_s29  ;;  %s132_s27 = sand.u32 1, %s499_s10  }
  0xec   : > { %v182_v28 = vstv %s179_s30  ;;  %s385_s5 = spop %384  ;;  %s361_s28 = sshll.u32 %s132_s27, 4 }
  0xed   : > { %441 = vrcp.f32 %v182_v28  ;;  %s387_s6 = spop %386  ;;  %s134_s29 = scalar_lea.vmem [#allocation2], %s361_s28 }
  0xee   : > { %s295_s30 = sshll.u32 %s134_s29, 4  ;;  %s612_s30 = int_to_ptr.vmem [resolvable:$true] %s295_s30 }
  0xf5   : > { %v440_v30 = vpop.eup %439 }
  0xf6   : > { %388 = vpush %v440_v30 }
  0xf7   : > { %v442_v31 = vpop.eup %441 }
  0xf8   : > { %390 = vpush %v442_v31 }
 0x127   : > { %s389_s7 = spop %388 }
 0x128   : > { %s177_s8 = smul.f32 %s389_s7, %s385_s5  ;;  %s619_s7 = scalar_lea.sflag [#allocation3], %s132_s27 }
 0x129   : > { %s391_s17 = spop %390 }
 0x12a   : > { %s180_s14 = smul.f32 %s385_s5, %s177_s8  ;;  %v190_v34 = vstv %s177_s8  ;;  %s445_s8 = scalar_lea.vmem %s612_s30, 256 }
 0x12b   : > { %v191_v35 = vsub.f32 %v584_v0, %v190_v34  ;;  %p446_p11 = scmp.ne.s32.totalorder %s612_s30, %s445_s8 }
 0x12c   : > { %s181_s16 = ssub.f32 %s387_s6, %s180_s14  ;;  %s617_s6 = scalar_lea.hbm %s662_s2, %s373_s3 }
 0x12d   : > { %p447_p12 = pnand %p446_p11, %p569_p5  ;;  %s449_s14 = sshll.u32 %s513_s13, 4  ;;  %s450_s14 = int_to_ptr.vmem [resolvable:$false] %s449_s14 }
 0x12e   : > { %s185_s21 = smul.f32 %s391_s17, %s181_s16  ;;  %s451_s16 = scalar_lea.vmem %s450_s14, 512 }
 0x12f   : > { %p448_p13 = pneg %p447_p12  ;;  %p452_p0 = scmp.lt.s32.totalorder %s612_s30, %s450_s14 }
 0x130   : > { %s186_s23 = smax.f32 %s512_s22, %s185_s21  ;;  %p453_p1 = scmp.lt.s32.totalorder %s451_s16, %s445_s8 }
 0x131   : > { %v187_v32 = vstv %s186_s23 }
 0x132   : > { %443 = vrsqrt.f32 %v187_v32  ;;  %p454_p2 = por %p453_p1, %p452_p0 }
 0x134   : > { %p455_p3 = pnand %p454_p2, %p448_p13 }
 0x13c   : > { %v444_v33 = vpop.eup %443 }
 0x13d   : > { %392 = vpush %v444_v33 }
 0x16e   : > { %s393_s24 = spop %392 }
 0x16f   : > { %v192_v36 = vstv %s393_s24 }
 0x170   : > { %v193_v37 = vmul.f32 %v192_v36, %v191_v35 }
 0x172   : > { %377 = vmatprep.subr.msk.mxu0 %vm588_vm2, %v193_v37 }
 0x173   : > { %378 = vmatpush3.msk.msra.mxu0 %vm588_vm2, %v193_v37 }
 0x174   : > { %380 = vmatmul.mubr.msk.f32.vlgmr.msra.gmra.mrb[0].mxu0 %vm197_vm3, %v196_v38 }
 0x247   : > { %v381_v39 = vpop.f32.mrb[0].mxu0 }
 0x248   : > { %280 = vst [vmem:[%s134_s29 + $0x8] sm:$0xff] %v381_v39  ;;  %v270_v40 = vpop.f32.mrb[1].mxu0 }
 0x249   : > { %279 = vst [vmem:[%s134_s29] sm:$0xff] %v270_v40 }
 0x24a   : > { %458 = shalt.err (!%p455_p3)
}
 0x24b   : > { %s459_s17 = scalar_lea.hbm %s617_s6, 256  ;;  %s463_s23 = scalar_lea.hbm %s662_s2, 512 }
 0x24c   : > { %p460_p4 = scmp.ne.s32.totalorder %s617_s6, %s459_s17  ;;  %p464_p9 = scmp.lt.u32.totalorder %s617_s6, %s662_s2 }
 0x24d   : > { %p465_p10 = scmp.lt.u32.totalorder %s463_s23, %s459_s17  ;;  %p467_p12 = scmp.lt.u32.totalorder %s459_s17, %s617_s6 }
 0x24e   : > { %p461_p7 = pnand %p460_p4, %p569_p5 }
 0x24f   : > { %p466_p11 = por %p465_p10, %p464_p9 }
 0x250   : > { %p462_p8 = pneg %p461_p7 }
 0x251   : > { %p468_p13 = por %p467_p12, %p466_p11 }
 0x253   : > { %p469_p0 = pnand %p468_p13, %p462_p8 }
 0x255   : > { %472 = shalt.err (!%p469_p0)
}
 0x256   : > { %s514_s26 = smov 128   ;;  %s515_s27 = smov 8  }
 0x257   : > { %394 = dma.vmem_to_hbm [thread:$0]  (%p569_p5), %s612_s30, 256, %s617_s6, %s619_s7, %s514_s26, %s514_s26, %s515_s27  }
 0x258 PF: > { %p400_p1 = scmp.ge.s32.totalorder %s507_s12, 2  ;;  %s310_s28 = sand.u32 1, %s495_s9  }
 0x259   : > { %s311_s29 = scalar_lea.sflag [#allocation3], %s310_s28 }
 0x25a   : > { %p397_p2 = pnand %p400_p1, %p573_p6 }
 0x25c   : > { %490 = dma.done.wait (!%p397_p2), %s311_s29, 256  }
 0x25d   : > { %492 = vsyncadd (!%p397_p2), %s311_s29, 4294967040  ;;  %p12_p3 = scmp.ge.s32.totalorder %s556_s15, 4   ;;  %s667_s9 = smov %s499_s10 }
 0x25e   : > { %s668_s10 = smov %s503_s11  ;;  %s669_s11 = smov %s567_s18 }
 0x25f   : > { %s670_s12 = smov %s556_s15  ;;  %14 = sbr.rel (!%p12_p3) target bundleno = 3 (0x3), region = 63 }
 0x266   :  { %316 = vsyncpa [#allocation3], 1 }
 0x267   :  { %318 = vsyncpa [#allocation3 + $0x1], 1 }

</bundles_post_ra>
